<compile_context>
chip_gen: v6e
topology: v6e:2x2x1
jax: 0.10.0
libtpu: 0.0.40
codegen_flags: <defaults>
</compile_context>

<pallas_src>
import functools

import numpy as np

import jax
import jax.numpy as jnp
from jax.experimental import pallas as pl
from jax.experimental.pallas import tpu as pltpu


def _border_masks(H, W):
    """(9, H*W) float32 0/1 masks, row t = kh*3 + kw, encoding padding=1."""
    h = np.arange(H)[:, None]
    w = np.arange(W)[None, :]
    rows = []
    for kh in range(3):
        for kw in range(3):
            dh, dw = kh - 1, kw - 1
            valid = ((h + dh >= 0) & (h + dh < H) &
                     (w + dw >= 0) & (w + dw < W))
            rows.append(valid.reshape(-1))
    return jnp.asarray(np.stack(rows).astype(np.float32))


def _choose_batch_block(N, C, P, budget_bytes=8 << 20):
    """Images per grid step.

    Large enough to amortize per-step overhead / tiny DMAs, small enough to
    stay far inside VMEM (budget chosen conservatively vs v7x's 64 MiB
    physical / 32 MiB default scoped limit), and leaving >= 2 grid steps when
    possible so both v7x TensorCores get work.
    """
    per_img = 4 * P * 2 * (C + 3 * C)      # double-buffered input + output blocks
    fixed = 4 * P * 18 * C                 # shared im2col scratch
    max_blk = max(1, (budget_bytes - fixed) // per_img)
    divisors = [d for d in range(1, N + 1) if N % d == 0 and d <= max_blk]
    for d in sorted(divisors, reverse=True):
        if N // d >= 2:
            return d
    return max(divisors)


def _dense_block_kernel(x_ref, mask_ref, w1_ref, b1_ref, w2_ref, b2_ref,
                        o_ref, stack_ref, *, H, W, C, B):
    """One batch block (B images) of DenseBlock.

    x_ref    : (B,  C, P)   inputs; channels on sublanes, P = H*W on lanes
    mask_ref : (9,  P)      0/1 border masks, row t = kh*3 + kw (zero padding)
    w1_ref   : (C,  9C)     conv1 weight, columns ordered (kh, kw, cin)
    b1_ref   : (C,  1)
    w2_ref   : (C, 18C)     conv2 weight, columns = [x-taps | y1-taps],
                            each group ordered (kh, kw, cin)
    b2_ref   : (C,  1)
    o_ref    : (B, 3C, P)   fused DenseBlock output [x | y1 | y2]
    stack_ref: (18C, P)     merged im2col scratch, reused across the B images
    """
    P = H * W

    # Hoist all shared loads out of the unrolled loops (JAX does not CSE
    # broadcast/reload chains across unrolled iterations).
    mask = mask_ref[...]                       # (9, P)
    mask_rows = [mask[t:t + 1, :] for t in range(9)]
    w1 = w1_ref[...]
    w2 = w2_ref[...]
    b1 = b1_ref[...]
    b2 = b2_ref[...]

    def lrelu(v):
        # leaky_relu(v, 0.2) == max(v, 0.2*v): 2 VALU ops vs cmp+select+mul.
        return jnp.maximum(v, 0.2 * v)

    def write_taps(val, base):
        # stack[base + t*C + c, p] = val[c, (p + s_t) % P] * mask[t, p]
        # i.e. the 9 spatially shifted copies of `val` with out-of-image
        # pixels zeroed (the conv's zero padding).  The shift runs on the XLU
        # via pltpu.roll and each tap is ONE full-width, lane-dense store.
        for t in range(9):
            kh, kw = divmod(t, 3)
            s = (kh - 1) * W + (kw - 1)              # static pixel offset
            shifted = val if s == 0 else pltpu.roll(val, (-s) % P, 1)
            stack_ref[base + t * C:base + (t + 1) * C, :] = (
                shifted * mask_rows[t])

    for b in range(B):                               # static unroll over block
        x = x_ref[b]                                 # (C, P), loaded once

        # conv1 + leaky_relu: fill rows [0:9C) of the merged stack, then ONE
        # MXU matmul with K = 9C and lane-dense N = H*W.
        write_taps(x, 0)
        y1 = lrelu(jnp.dot(w1, stack_ref[0:9 * C, :],
                           preferred_element_type=jnp.float32) + b1)

        # conv2 + leaky_relu over x1 = [x | y1]: the x-taps are already in
        # rows [0:9C); add the y1-taps straight from the register value (no
        # VMEM round trip) and do ONE MXU matmul with K = 18C.
        write_taps(y1, 9 * C)
        y2 = lrelu(jnp.dot(w2, stack_ref[...],
                           preferred_element_type=jnp.float32) + b2)

        # Fused "dense" concatenation straight into the lane-dense output.
        if C % 8 == 0:
            # Sublane-tile aligned: single unmasked (3C, P) store.
            o_ref[b] = jnp.concatenate([x, y1, y2], axis=0).astype(o_ref.dtype)
        else:
            # Sub-tile channel count (e.g. C=4): three slice stores.
            o_ref[b, 0:C, :] = x.astype(o_ref.dtype)
            o_ref[b, C:2 * C, :] = y1.astype(o_ref.dtype)
            o_ref[b, 2 * C:3 * C, :] = y2.astype(o_ref.dtype)


def dense_block(x_nchw, params, *, batch_block=None):
    """DenseBlock forward pass; input/output use PyTorch's NCHW convention."""
    N, C, H, W = x_nchw.shape
    P = H * W
    if batch_block is None:
        batch_block = _choose_batch_block(N, C, P)
    B = batch_block
    assert N % B == 0

    # Free, row-major-preserving reshapes only (no transpose, no padding).
    x_flat = x_nchw.reshape(N, C, P)
    masks = _border_masks(H, W)

    # (Cout, Cin, 3, 3) -> (Cout, 9*Cin) with columns ordered (kh, kw, cin),
    # matching the tap-row order of the im2col stack.  conv2's columns are
    # regrouped as [all x-taps | all y1-taps] so conv1 and conv2 share the
    # x-tap rows of one merged stack.
    w1m = jnp.transpose(params["w1"], (0, 2, 3, 1)).reshape(C, 9 * C)
    w2x = jnp.transpose(params["w2"][:, :C], (0, 2, 3, 1)).reshape(C, 9 * C)
    w2y = jnp.transpose(params["w2"][:, C:], (0, 2, 3, 1)).reshape(C, 9 * C)
    w2m = jnp.concatenate([w2x, w2y], axis=1)
    b1 = params["b1"].reshape(C, 1)
    b2 = params["b2"].reshape(C, 1)

    kernel = functools.partial(_dense_block_kernel, H=H, W=W, C=C, B=B)
    out = pl.pallas_call(
        kernel,
        out_shape=jax.ShapeDtypeStruct((N, 3 * C, P), x_nchw.dtype),
        grid_spec=pltpu.PrefetchScalarGridSpec(
            num_scalar_prefetch=0,
            grid=(N // B,),
            in_specs=[
                pl.BlockSpec((B, C, P), lambda n: (n, 0, 0)),
                pl.BlockSpec((9, P), lambda n: (0, 0)),
                pl.BlockSpec((C, 9 * C), lambda n: (0, 0)),
                pl.BlockSpec((C, 1), lambda n: (0, 0)),
                pl.BlockSpec((C, 18 * C), lambda n: (0, 0)),
                pl.BlockSpec((C, 1), lambda n: (0, 0)),
            ],
            out_specs=pl.BlockSpec((B, 3 * C, P), lambda n: (n, 0, 0)),
            scratch_shapes=[
                pltpu.VMEM((18 * C, P), jnp.float32),   # merged im2col stack
            ],
        ),
        compiler_params=pltpu.CompilerParams(
            dimension_semantics=("parallel",)),
    )(x_flat, masks, w1m, b1, w2m, b2)

    return out.reshape(N, 3 * C, H, W)


def init_params(key, channels):
    """PyTorch-style Conv2d init; weights kept in OIHW like nn.Conv2d."""
    c = channels
    k1, k2, k3, k4 = jax.random.split(key, 4)
    bnd1 = 1.0 / float(np.sqrt(c * 9))
    bnd2 = 1.0 / float(np.sqrt(2 * c * 9))
    return {
        "w1": jax.random.uniform(k1, (c, c, 3, 3), jnp.float32, -bnd1, bnd1),
        "b1": jax.random.uniform(k2, (c,), jnp.float32, -bnd1, bnd1),
        "w2": jax.random.uniform(k3, (c, 2 * c, 3, 3), jnp.float32, -bnd2, bnd2),
        "b2": jax.random.uniform(k4, (c,), jnp.float32, -bnd2, bnd2),
    }


def _ref_conv_lrelu(x, w, b):
    """Pure-JAX reference: NCHW/OIHW conv + bias + leaky_relu(0.2)."""
    y = jax.lax.conv_general_dilated(
        x, w, window_strides=(1, 1), padding=((1, 1), (1, 1)),
        dimension_numbers=("NCHW", "OIHW", "NCHW"))
    y = y + b.reshape(1, -1, 1, 1)
    return jnp.where(y >= 0, y, 0.2 * y)


def _ref_dense_block(x, params):
    x1 = jnp.concatenate(
        [x, _ref_conv_lrelu(x, params["w1"], params["b1"])], axis=1)
    return jnp.concatenate(
        [x1, _ref_conv_lrelu(x1, params["w2"], params["b2"])], axis=1)


if __name__ == "__main__":
    key = jax.random.PRNGKey(0)
    configs = [
        (2, 4, 16, 16),   # batch_block = 1 path, sub-tile C output path
        (4, 4, 16, 16),   # batch_block = 2 path: multiple images per grid step
        (2, 8, 16, 16),   # C % 8 == 0 path: single fused output store
    ]
    for (N, C, H, W) in configs:
        kx, kp, key = jax.random.split(key, 3)
        x = jax.random.normal(kx, (N, C, H, W), jnp.float32)
        params = init_params(kp, C)

        out = jax.block_until_ready(jax.jit(dense_block)(x, params))
        assert out.shape == (N, 3 * C, H, W), out.shape

        ref = _ref_dense_block(x, params)
        err = float(jnp.max(jnp.abs(out - ref)))
        assert jnp.allclose(out, ref, atol=1e-4, rtol=1e-4), ((N, C, H, W), err)

    print("KERNEL_OK")
</pallas_src>

<mosaic_0001>
module attributes {stable_mosaic.version = 11 : i64} {
  func.func @_dense_block_kernel(%arg0: i32, %arg1: memref<1x4x256xf32, #tpu.memory_space<vmem>>, %arg2: memref<9x256xf32, #tpu.memory_space<vmem>>, %arg3: memref<4x36xf32, #tpu.memory_space<vmem>>, %arg4: memref<4x1xf32, #tpu.memory_space<vmem>>, %arg5: memref<4x72xf32, #tpu.memory_space<vmem>>, %arg6: memref<4x1xf32, #tpu.memory_space<vmem>>, %arg7: memref<1x12x256xf32, #tpu.memory_space<vmem>>, %arg8: memref<72x256xf32, #tpu.memory_space<vmem>>) attributes {dimension_semantics = [#tpu.dimension_semantics<parallel>], iteration_bounds = array<i64: 2>, scalar_prefetch = 0 : i64, scratch_operands = 1 : i64, tpu.core_type = #tpu.core_type<tc>, window_params = [{transform_indices = @transform_0, window_bounds = array<i64: 1, 4, 256>}, {pipeline_mode = #tpu.pipeline_mode<synchronous>, transform_indices = @transform_1, window_bounds = array<i64: 9, 256>}, {pipeline_mode = #tpu.pipeline_mode<synchronous>, transform_indices = @transform_2, window_bounds = array<i64: 4, 36>}, {pipeline_mode = #tpu.pipeline_mode<synchronous>, transform_indices = @transform_3, window_bounds = array<i64: 4, 1>}, {pipeline_mode = #tpu.pipeline_mode<synchronous>, transform_indices = @transform_4, window_bounds = array<i64: 4, 72>}, {pipeline_mode = #tpu.pipeline_mode<synchronous>, transform_indices = @transform_5, window_bounds = array<i64: 4, 1>}, {transform_indices = @transform_6, window_bounds = array<i64: 1, 12, 256>}]} {
    %c0 = arith.constant 0 : index
    %c0_0 = arith.constant 0 : index
    %0 = vector.load %arg2[%c0, %c0_0] : memref<9x256xf32, #tpu.memory_space<vmem>>, vector<9x256xf32>
    %1 = vector.extract_strided_slice %0 {offsets = [0, 0], sizes = [1, 256], strides = [1, 1]} : vector<9x256xf32> to vector<1x256xf32>
    %2 = vector.extract_strided_slice %0 {offsets = [1, 0], sizes = [1, 256], strides = [1, 1]} : vector<9x256xf32> to vector<1x256xf32>
    %3 = vector.extract_strided_slice %0 {offsets = [2, 0], sizes = [1, 256], strides = [1, 1]} : vector<9x256xf32> to vector<1x256xf32>
    %4 = vector.extract_strided_slice %0 {offsets = [3, 0], sizes = [1, 256], strides = [1, 1]} : vector<9x256xf32> to vector<1x256xf32>
    %5 = vector.extract_strided_slice %0 {offsets = [4, 0], sizes = [1, 256], strides = [1, 1]} : vector<9x256xf32> to vector<1x256xf32>
    %6 = vector.extract_strided_slice %0 {offsets = [5, 0], sizes = [1, 256], strides = [1, 1]} : vector<9x256xf32> to vector<1x256xf32>
    %7 = vector.extract_strided_slice %0 {offsets = [6, 0], sizes = [1, 256], strides = [1, 1]} : vector<9x256xf32> to vector<1x256xf32>
    %8 = vector.extract_strided_slice %0 {offsets = [7, 0], sizes = [1, 256], strides = [1, 1]} : vector<9x256xf32> to vector<1x256xf32>
    %9 = vector.extract_strided_slice %0 {offsets = [8, 0], sizes = [1, 256], strides = [1, 1]} : vector<9x256xf32> to vector<1x256xf32>
    %c0_1 = arith.constant 0 : index
    %c0_2 = arith.constant 0 : index
    %10 = vector.load %arg3[%c0_1, %c0_2] : memref<4x36xf32, #tpu.memory_space<vmem>>, vector<4x36xf32>
    %c0_3 = arith.constant 0 : index
    %c0_4 = arith.constant 0 : index
    %11 = vector.load %arg5[%c0_3, %c0_4] : memref<4x72xf32, #tpu.memory_space<vmem>>, vector<4x72xf32>
    %c0_5 = arith.constant 0 : index
    %c0_6 = arith.constant 0 : index
    %12 = vector.load %arg4[%c0_5, %c0_6] : memref<4x1xf32, #tpu.memory_space<vmem>>, vector<4x1xf32>
    %c0_7 = arith.constant 0 : index
    %c0_8 = arith.constant 0 : index
    %13 = vector.load %arg6[%c0_7, %c0_8] : memref<4x1xf32, #tpu.memory_space<vmem>>, vector<4x1xf32>
    %c0_9 = arith.constant 0 : index
    %c0_10 = arith.constant 0 : index
    %c0_11 = arith.constant 0 : index
    %14 = vector.load %arg1[%c0_9, %c0_10, %c0_11] : memref<1x4x256xf32, #tpu.memory_space<vmem>>, vector<1x4x256xf32>
    %15 = vector.shape_cast %14 : vector<1x4x256xf32> to vector<4x256xf32>
    %c17_i32 = arith.constant 17 : i32
    %16 = tpu.dynamic_rotate %15 by %c17_i32 dim 1 : vector<4x256xf32>, i32 -> vector<4x256xf32>
    %17 = vector.broadcast %1 : vector<1x256xf32> to vector<4x256xf32>
    %18 = arith.mulf %16, %17 : vector<4x256xf32>
    %c0_12 = arith.constant 0 : index
    %c0_13 = arith.constant 0 : index
    %19 = vector.load %arg8[%c0_12, %c0_13] : memref<72x256xf32, #tpu.memory_space<vmem>>, vector<4x256xf32>
    tpu.vector_store %arg8[%c0_12, %c0_13], %18 {strides = array<i32>} : memref<72x256xf32, #tpu.memory_space<vmem>>, vector<4x256xf32>,
    %c16_i32 = arith.constant 16 : i32
    %20 = tpu.dynamic_rotate %15 by %c16_i32 dim 1 : vector<4x256xf32>, i32 -> vector<4x256xf32>
    %21 = vector.broadcast %2 : vector<1x256xf32> to vector<4x256xf32>
    %22 = arith.mulf %20, %21 : vector<4x256xf32>
    %c4 = arith.constant 4 : index
    %c0_14 = arith.constant 0 : index
    %23 = vector.load %arg8[%c4, %c0_14] : memref<72x256xf32, #tpu.memory_space<vmem>>, vector<4x256xf32>
    tpu.vector_store %arg8[%c4, %c0_14], %22 {strides = array<i32>} : memref<72x256xf32, #tpu.memory_space<vmem>>, vector<4x256xf32>,
    %c15_i32 = arith.constant 15 : i32
    %24 = tpu.dynamic_rotate %15 by %c15_i32 dim 1 : vector<4x256xf32>, i32 -> vector<4x256xf32>
    %25 = vector.broadcast %3 : vector<1x256xf32> to vector<4x256xf32>
    %26 = arith.mulf %24, %25 : vector<4x256xf32>
    %c8 = arith.constant 8 : index
    %c0_15 = arith.constant 0 : index
    %27 = vector.load %arg8[%c8, %c0_15] : memref<72x256xf32, #tpu.memory_space<vmem>>, vector<4x256xf32>
    tpu.vector_store %arg8[%c8, %c0_15], %26 {strides = array<i32>} : memref<72x256xf32, #tpu.memory_space<vmem>>, vector<4x256xf32>,
    %c1_i32 = arith.constant 1 : i32
    %28 = tpu.dynamic_rotate %15 by %c1_i32 dim 1 : vector<4x256xf32>, i32 -> vector<4x256xf32>
    %29 = vector.broadcast %4 : vector<1x256xf32> to vector<4x256xf32>
    %30 = arith.mulf %28, %29 : vector<4x256xf32>
    %c12 = arith.constant 12 : index
    %c0_16 = arith.constant 0 : index
    %31 = vector.load %arg8[%c12, %c0_16] : memref<72x256xf32, #tpu.memory_space<vmem>>, vector<4x256xf32>
    tpu.vector_store %arg8[%c12, %c0_16], %30 {strides = array<i32>} : memref<72x256xf32, #tpu.memory_space<vmem>>, vector<4x256xf32>,
    %32 = vector.broadcast %5 : vector<1x256xf32> to vector<4x256xf32>
    %33 = arith.mulf %15, %32 : vector<4x256xf32>
    %c16 = arith.constant 16 : index
    %c0_17 = arith.constant 0 : index
    %34 = vector.load %arg8[%c16, %c0_17] : memref<72x256xf32, #tpu.memory_space<vmem>>, vector<4x256xf32>
    tpu.vector_store %arg8[%c16, %c0_17], %33 {strides = array<i32>} : memref<72x256xf32, #tpu.memory_space<vmem>>, vector<4x256xf32>,
    %c255_i32 = arith.constant 255 : i32
    %35 = tpu.dynamic_rotate %15 by %c255_i32 dim 1 : vector<4x256xf32>, i32 -> vector<4x256xf32>
    %36 = vector.broadcast %6 : vector<1x256xf32> to vector<4x256xf32>
    %37 = arith.mulf %35, %36 : vector<4x256xf32>
    %c20 = arith.constant 20 : index
    %c0_18 = arith.constant 0 : index
    %38 = vector.load %arg8[%c20, %c0_18] : memref<72x256xf32, #tpu.memory_space<vmem>>, vector<4x256xf32>
    tpu.vector_store %arg8[%c20, %c0_18], %37 {strides = array<i32>} : memref<72x256xf32, #tpu.memory_space<vmem>>, vector<4x256xf32>,
    %c241_i32 = arith.constant 241 : i32
    %39 = tpu.dynamic_rotate %15 by %c241_i32 dim 1 : vector<4x256xf32>, i32 -> vector<4x256xf32>
    %40 = vector.broadcast %7 : vector<1x256xf32> to vector<4x256xf32>
    %41 = arith.mulf %39, %40 : vector<4x256xf32>
    %c24 = arith.constant 24 : index
    %c0_19 = arith.constant 0 : index
    %42 = vector.load %arg8[%c24, %c0_19] : memref<72x256xf32, #tpu.memory_space<vmem>>, vector<4x256xf32>
    tpu.vector_store %arg8[%c24, %c0_19], %41 {strides = array<i32>} : memref<72x256xf32, #tpu.memory_space<vmem>>, vector<4x256xf32>,
    %c240_i32 = arith.constant 240 : i32
    %43 = tpu.dynamic_rotate %15 by %c240_i32 dim 1 : vector<4x256xf32>, i32 -> vector<4x256xf32>
    %44 = vector.broadcast %8 : vector<1x256xf32> to vector<4x256xf32>
    %45 = arith.mulf %43, %44 : vector<4x256xf32>
    %c28 = arith.constant 28 : index
    %c0_20 = arith.constant 0 : index
    %46 = vector.load %arg8[%c28, %c0_20] : memref<72x256xf32, #tpu.memory_space<vmem>>, vector<4x256xf32>
    tpu.vector_store %arg8[%c28, %c0_20], %45 {strides = array<i32>} : memref<72x256xf32, #tpu.memory_space<vmem>>, vector<4x256xf32>,
    %c239_i32 = arith.constant 239 : i32
    %47 = tpu.dynamic_rotate %15 by %c239_i32 dim 1 : vector<4x256xf32>, i32 -> vector<4x256xf32>
    %48 = vector.broadcast %9 : vector<1x256xf32> to vector<4x256xf32>
    %49 = arith.mulf %47, %48 : vector<4x256xf32>
    %c32 = arith.constant 32 : index
    %c0_21 = arith.constant 0 : index
    %50 = vector.load %arg8[%c32, %c0_21] : memref<72x256xf32, #tpu.memory_space<vmem>>, vector<4x256xf32>
    tpu.vector_store %arg8[%c32, %c0_21], %49 {strides = array<i32>} : memref<72x256xf32, #tpu.memory_space<vmem>>, vector<4x256xf32>,
    %c0_22 = arith.constant 0 : index
    %c0_23 = arith.constant 0 : index
    %51 = vector.load %arg8[%c0_22, %c0_23] : memref<72x256xf32, #tpu.memory_space<vmem>>, vector<36x256xf32>
    %cst = arith.constant dense<0.000000e+00> : vector<4x256xf32>
    %52 = tpu.matmul %10, %51, %cst {dimension_numbers = #tpu.dot_dimension_numbers<[1], [0], [0], [1], [0, 0, 1, 1], [], []>} : vector<4x36xf32>, vector<36x256xf32>, vector<4x256xf32> -> vector<4x256xf32>
    %53 = vector.broadcast %12 : vector<4x1xf32> to vector<4x256xf32>
    %54 = arith.addf %52, %53 : vector<4x256xf32>
    %cst_24 = arith.constant 2.000000e-01 : f32
    %55 = vector.broadcast %cst_24 : f32 to vector<4x256xf32>
    %56 = arith.mulf %55, %54 : vector<4x256xf32>
    %57 = arith.maximumf %54, %56 : vector<4x256xf32>
    %c17_i32_25 = arith.constant 17 : i32
    %58 = tpu.dynamic_rotate %57 by %c17_i32_25 dim 1 : vector<4x256xf32>, i32 -> vector<4x256xf32>
    %59 = vector.broadcast %1 : vector<1x256xf32> to vector<4x256xf32>
    %60 = arith.mulf %58, %59 : vector<4x256xf32>
    %c36 = arith.constant 36 : index
    %c0_26 = arith.constant 0 : index
    %61 = vector.load %arg8[%c36, %c0_26] : memref<72x256xf32, #tpu.memory_space<vmem>>, vector<4x256xf32>
    tpu.vector_store %arg8[%c36, %c0_26], %60 {strides = array<i32>} : memref<72x256xf32, #tpu.memory_space<vmem>>, vector<4x256xf32>,
    %c16_i32_27 = arith.constant 16 : i32
    %62 = tpu.dynamic_rotate %57 by %c16_i32_27 dim 1 : vector<4x256xf32>, i32 -> vector<4x256xf32>
    %63 = vector.broadcast %2 : vector<1x256xf32> to vector<4x256xf32>
    %64 = arith.mulf %62, %63 : vector<4x256xf32>
    %c40 = arith.constant 40 : index
    %c0_28 = arith.constant 0 : index
    %65 = vector.load %arg8[%c40, %c0_28] : memref<72x256xf32, #tpu.memory_space<vmem>>, vector<4x256xf32>
    tpu.vector_store %arg8[%c40, %c0_28], %64 {strides = array<i32>} : memref<72x256xf32, #tpu.memory_space<vmem>>, vector<4x256xf32>,
    %c15_i32_29 = arith.constant 15 : i32
    %66 = tpu.dynamic_rotate %57 by %c15_i32_29 dim 1 : vector<4x256xf32>, i32 -> vector<4x256xf32>
    %67 = vector.broadcast %3 : vector<1x256xf32> to vector<4x256xf32>
    %68 = arith.mulf %66, %67 : vector<4x256xf32>
    %c44 = arith.constant 44 : index
    %c0_30 = arith.constant 0 : index
    %69 = vector.load %arg8[%c44, %c0_30] : memref<72x256xf32, #tpu.memory_space<vmem>>, vector<4x256xf32>
    tpu.vector_store %arg8[%c44, %c0_30], %68 {strides = array<i32>} : memref<72x256xf32, #tpu.memory_space<vmem>>, vector<4x256xf32>,
    %c1_i32_31 = arith.constant 1 : i32
    %70 = tpu.dynamic_rotate %57 by %c1_i32_31 dim 1 : vector<4x256xf32>, i32 -> vector<4x256xf32>
    %71 = vector.broadcast %4 : vector<1x256xf32> to vector<4x256xf32>
    %72 = arith.mulf %70, %71 : vector<4x256xf32>
    %c48 = arith.constant 48 : index
    %c0_32 = arith.constant 0 : index
    %73 = vector.load %arg8[%c48, %c0_32] : memref<72x256xf32, #tpu.memory_space<vmem>>, vector<4x256xf32>
    tpu.vector_store %arg8[%c48, %c0_32], %72 {strides = array<i32>} : memref<72x256xf32, #tpu.memory_space<vmem>>, vector<4x256xf32>,
    %74 = vector.broadcast %5 : vector<1x256xf32> to vector<4x256xf32>
    %75 = arith.mulf %57, %74 : vector<4x256xf32>
    %c52 = arith.constant 52 : index
    %c0_33 = arith.constant 0 : index
    %76 = vector.load %arg8[%c52, %c0_33] : memref<72x256xf32, #tpu.memory_space<vmem>>, vector<4x256xf32>
    tpu.vector_store %arg8[%c52, %c0_33], %75 {strides = array<i32>} : memref<72x256xf32, #tpu.memory_space<vmem>>, vector<4x256xf32>,
    %c255_i32_34 = arith.constant 255 : i32
    %77 = tpu.dynamic_rotate %57 by %c255_i32_34 dim 1 : vector<4x256xf32>, i32 -> vector<4x256xf32>
    %78 = vector.broadcast %6 : vector<1x256xf32> to vector<4x256xf32>
    %79 = arith.mulf %77, %78 : vector<4x256xf32>
    %c56 = arith.constant 56 : index
    %c0_35 = arith.constant 0 : index
    %80 = vector.load %arg8[%c56, %c0_35] : memref<72x256xf32, #tpu.memory_space<vmem>>, vector<4x256xf32>
    tpu.vector_store %arg8[%c56, %c0_35], %79 {strides = array<i32>} : memref<72x256xf32, #tpu.memory_space<vmem>>, vector<4x256xf32>,
    %c241_i32_36 = arith.constant 241 : i32
    %81 = tpu.dynamic_rotate %57 by %c241_i32_36 dim 1 : vector<4x256xf32>, i32 -> vector<4x256xf32>
    %82 = vector.broadcast %7 : vector<1x256xf32> to vector<4x256xf32>
    %83 = arith.mulf %81, %82 : vector<4x256xf32>
    %c60 = arith.constant 60 : index
    %c0_37 = arith.constant 0 : index
    %84 = vector.load %arg8[%c60, %c0_37] : memref<72x256xf32, #tpu.memory_space<vmem>>, vector<4x256xf32>
    tpu.vector_store %arg8[%c60, %c0_37], %83 {strides = array<i32>} : memref<72x256xf32, #tpu.memory_space<vmem>>, vector<4x256xf32>,
    %c240_i32_38 = arith.constant 240 : i32
    %85 = tpu.dynamic_rotate %57 by %c240_i32_38 dim 1 : vector<4x256xf32>, i32 -> vector<4x256xf32>
    %86 = vector.broadcast %8 : vector<1x256xf32> to vector<4x256xf32>
    %87 = arith.mulf %85, %86 : vector<4x256xf32>
    %c64 = arith.constant 64 : index
    %c0_39 = arith.constant 0 : index
    %88 = vector.load %arg8[%c64, %c0_39] : memref<72x256xf32, #tpu.memory_space<vmem>>, vector<4x256xf32>
    tpu.vector_store %arg8[%c64, %c0_39], %87 {strides = array<i32>} : memref<72x256xf32, #tpu.memory_space<vmem>>, vector<4x256xf32>,
    %c239_i32_40 = arith.constant 239 : i32
    %89 = tpu.dynamic_rotate %57 by %c239_i32_40 dim 1 : vector<4x256xf32>, i32 -> vector<4x256xf32>
    %90 = vector.broadcast %9 : vector<1x256xf32> to vector<4x256xf32>
    %91 = arith.mulf %89, %90 : vector<4x256xf32>
    %c68 = arith.constant 68 : index
    %c0_41 = arith.constant 0 : index
    %92 = vector.load %arg8[%c68, %c0_41] : memref<72x256xf32, #tpu.memory_space<vmem>>, vector<4x256xf32>
    tpu.vector_store %arg8[%c68, %c0_41], %91 {strides = array<i32>} : memref<72x256xf32, #tpu.memory_space<vmem>>, vector<4x256xf32>,
    %c0_42 = arith.constant 0 : index
    %c0_43 = arith.constant 0 : index
    %93 = vector.load %arg8[%c0_42, %c0_43] : memref<72x256xf32, #tpu.memory_space<vmem>>, vector<72x256xf32>
    %cst_44 = arith.constant dense<0.000000e+00> : vector<4x256xf32>
    %94 = tpu.matmul %11, %93, %cst_44 {dimension_numbers = #tpu.dot_dimension_numbers<[1], [0], [0], [1], [0, 0, 1, 1], [], []>} : vector<4x72xf32>, vector<72x256xf32>, vector<4x256xf32> -> vector<4x256xf32>
    %95 = vector.broadcast %13 : vector<4x1xf32> to vector<4x256xf32>
    %96 = arith.addf %94, %95 : vector<4x256xf32>
    %cst_45 = arith.constant 2.000000e-01 : f32
    %97 = vector.broadcast %cst_45 : f32 to vector<4x256xf32>
    %98 = arith.mulf %97, %96 : vector<4x256xf32>
    %99 = arith.maximumf %96, %98 : vector<4x256xf32>
    %c0_46 = arith.constant 0 : index
    %c0_47 = arith.constant 0 : index
    %c0_48 = arith.constant 0 : index
    %100 = vector.load %arg7[%c0_46, %c0_47, %c0_48] : memref<1x12x256xf32, #tpu.memory_space<vmem>>, vector<1x4x256xf32>
    %101 = vector.shape_cast %100 : vector<1x4x256xf32> to vector<4x256xf32>
    %102 = vector.shape_cast %15 : vector<4x256xf32> to vector<1x4x256xf32>
    tpu.vector_store %arg7[%c0_46, %c0_47, %c0_48], %102 {strides = array<i32>} : memref<1x12x256xf32, #tpu.memory_space<vmem>>, vector<1x4x256xf32>,
    %c0_49 = arith.constant 0 : index
    %c4_50 = arith.constant 4 : index
    %c0_51 = arith.constant 0 : index
    %103 = vector.load %arg7[%c0_49, %c4_50, %c0_51] : memref<1x12x256xf32, #tpu.memory_space<vmem>>, vector<1x4x256xf32>
    %104 = vector.shape_cast %103 : vector<1x4x256xf32> to vector<4x256xf32>
    %105 = vector.shape_cast %57 : vector<4x256xf32> to vector<1x4x256xf32>
    tpu.vector_store %arg7[%c0_49, %c4_50, %c0_51], %105 {strides = array<i32>} : memref<1x12x256xf32, #tpu.memory_space<vmem>>, vector<1x4x256xf32>,
    %c0_52 = arith.constant 0 : index
    %c8_53 = arith.constant 8 : index
    %c0_54 = arith.constant 0 : index
    %106 = vector.load %arg7[%c0_52, %c8_53, %c0_54] : memref<1x12x256xf32, #tpu.memory_space<vmem>>, vector<1x4x256xf32>
    %107 = vector.shape_cast %106 : vector<1x4x256xf32> to vector<4x256xf32>
    %108 = vector.shape_cast %99 : vector<4x256xf32> to vector<1x4x256xf32>
    tpu.vector_store %arg7[%c0_52, %c8_53, %c0_54], %108 {strides = array<i32>} : memref<1x12x256xf32, #tpu.memory_space<vmem>>, vector<1x4x256xf32>,
    return
  }
  func.func @transform_0(%arg0: i32) -> (i32, i32, i32) {
    %c0_i32 = arith.constant 0 : i32
    %c0_i32_0 = arith.constant 0 : i32
    %c0_i32_1 = arith.constant 0 : i32
    return %arg0, %c0_i32, %c0_i32_0 : i32, i32, i32
  }
  func.func @transform_1(%arg0: i32) -> (i32, i32) {
    %c0_i32 = arith.constant 0 : i32
    %c0_i32_0 = arith.constant 0 : i32
    %c0_i32_1 = arith.constant 0 : i32
    return %c0_i32, %c0_i32_0 : i32, i32
  }
  func.func @transform_2(%arg0: i32) -> (i32, i32) {
    %c0_i32 = arith.constant 0 : i32
    %c0_i32_0 = arith.constant 0 : i32
    %c0_i32_1 = arith.constant 0 : i32
    return %c0_i32, %c0_i32_0 : i32, i32
  }
  func.func @transform_3(%arg0: i32) -> (i32, i32) {
    %c0_i32 = arith.constant 0 : i32
    %c0_i32_0 = arith.constant 0 : i32
    %c0_i32_1 = arith.constant 0 : i32
    return %c0_i32, %c0_i32_0 : i32, i32
  }
  func.func @transform_4(%arg0: i32) -> (i32, i32) {
    %c0_i32 = arith.constant 0 : i32
    %c0_i32_0 = arith.constant 0 : i32
    %c0_i32_1 = arith.constant 0 : i32
    return %c0_i32, %c0_i32_0 : i32, i32
  }
  func.func @transform_5(%arg0: i32) -> (i32, i32) {
    %c0_i32 = arith.constant 0 : i32
    %c0_i32_0 = arith.constant 0 : i32
    %c0_i32_1 = arith.constant 0 : i32
    return %c0_i32, %c0_i32_0 : i32, i32
  }
  func.func @transform_6(%arg0: i32) -> (i32, i32, i32) {
    %c0_i32 = arith.constant 0 : i32
    %c0_i32_0 = arith.constant 0 : i32
    %c0_i32_1 = arith.constant 0 : i32
    return %arg0, %c0_i32, %c0_i32_0 : i32, i32, i32
  }
}

</mosaic_0001>

<bundles_post_ra>
// kernel: dense_block.1
= control target key start
LH: loop header
LB: loop body
LE: loop exit
PB: predicated region body
PF: predicated region fallthrough
CT: control target
= control target key end

     0   :  { %s936_s21 = smov 0   ;;  %s1228_s0 = inlined_call_operand.vmem [shape: f32[2,4,256], index: 0, kind: input, shape index: {}]   ;;  %s1229_s1 = inlined_call_operand.vmem [shape: f32[9,256], index: 1, kind: input, shape index: {}]   ;;  %s1230_s2 = inlined_call_operand.vmem [shape: f32[4,36], index: 2, kind: input, shape index: {}]   ;;  %s1231_s3 = inlined_call_operand.vmem [shape: f32[4,1], index: 3, kind: input, shape index: {}]   ;;  %s1232_s4 = inlined_call_operand.vmem [shape: f32[4,72], index: 4, kind: input, shape index: {}]   ;;  %s1233_s5 = inlined_call_operand.vmem [shape: f32[4,1], index: 5, kind: input, shape index: {}]   ;;  %s1234_s6 = inlined_call_operand.vmem [shape: f32[2,12,256], index: 6, kind: output, shape index: {}]  }
   0x1 LB: > { %s844_s22 = sadd.s32 4294967295, %s889_s21   ;;  %p848_p0 = scmp.ge.s32.totalorder %s889_s21, 1  ;;  %s889_s21 = sphi %s936_s21, %s16_s21  }
   0x2   : > { %p212_p1 = scmp.lt.s32.totalorder %s889_s21, 3 }
   0x4   : > { %p213_p2 = pnand %p848_p0, %p212_p1 }
   0x5   : > { %p242_p3 = scmp.lt.s32.totalorder (!%p213_p2), %s844_s22, 1  ;;  %s891_s7 = smov (!%p213_p2), 111  }
   0x6   : > { %216 = sbr.rel (%p213_p2) target bundleno = 742 (0x2e6), region = 44  ;;  %s892_s8 = smov (!%p213_p2), 112  }
   0x7   : > { %s893_s9 = smov (!%p213_p2), 127   ;;  %s894_s10 = smov (!%p213_p2), 113  }
   0x8   : > { %s895_s11 = smov (!%p213_p2), 1   ;;  %s896_s12 = smov (!%p213_p2), 16  }
   0x9   : > { %s897_s13 = smov (!%p213_p2), 15   ;;  %s899_s14 = smov (!%p213_p2), 17  }
   0xb   : > { %v268_v0 = vlaneseq  ;;  %s1236_s22 = smov (!%p242_p3, %s844_s22), 1  ;;  %v252_v2 = vld [vmem:[%s1229_s1] sm:$0xff]  ;;  %v253_v3 = vld [vmem:[%s1229_s1 + $0x8] sm:$0xff]  ;;  %v898_v33 = vmov 0.0   ;;  %v900_v34 = vmov 0   ;;  %vm479_vm4 = vcmask 1043456  }
   0xc   : > { %s861_s27 = sshll.u32 %s1236_s22, 3  ;;  %550 = vmatprep.mubr.f32.mxu0 %v898_v33  ;;  %766 = vmatprep.mubr.f32.mxu1 %v898_v33  ;;  %v258_v35 = vld [vmem:[%s1231_s3] sm:$0xf]  ;;  %v1040_v39 = vld [vmem:[%s1229_s1 + $0x10] ss:$0 sm:$0xff]  ;;  %vm475_vm9 = vcmask 293888  }
   0xd   : > { %v274_v1 = vshrl.u32 %v268_v0, 7  ;;  %s246_s30 = scalar_lea.vmem %s1228_s0, %s861_s27  ;;  %881 = vset.pattern.permute.xlu0 %v900_v34  ;;  %v1034_v36 = vand.u32 127, %v268_v0  ;;  %v1045_v40 = vld [vmem:[%s1229_s1 + $0x18] ss:$0 sm:$0xff]  ;;  %s862_s25 = sshll.u32 %s1236_s22, 5  ;;  %vm698_vm10 = vcmask 588800  }
   0xe   : > { %v957_v8 = vld [vmem:[%s246_s30] sm:$0xff]  ;;  %s1135_s28 = scalar_lea.vmem %s1234_s6, %s862_s25 }
   0xf   : > { %v356_v4 = vsub.s32 4, %v274_v1  ;;  %v381_v5 = vsub.s32 5, %v274_v1  ;;  %v425_v6 = vsub.s32 7, %v274_v1  ;;  %v406_v7 = vsub.s32 6, %v274_v1  ;;  %441 = vrot.lane.b32.xlu1 %v957_v8, %s891_s7  ;;  %416 = vrot.lane.b32.xlu0 %v957_v8, %s892_s8  ;;  %777 = vst [vmem:[%s1135_s28] sm:$0xf] %v957_v8 }
  0x10   : > { %v973_v13 = vcombine.high %v957_v8, %v957_v8  ;;  %v338_v16 = vsub.s32 3, %v274_v1  ;;  %v294_v23 = vsub.s32 1, %v274_v1  ;;  %v319_v27 = vsub.s32 2, %v274_v1 }
  0x11   : > { %v959_v9 = vrot.slane %v252_v2, %v356_v4  ;;  %v961_v10 = vrot.slane %v253_v3, %v356_v4  ;;  %v963_v11 = vrot.slane %v252_v2, %v381_v5  ;;  %v965_v12 = vrot.slane %v253_v3, %v381_v5 }
  0x12   : > { %v975_v14 = vrot.slane %v252_v2, %v425_v6  ;;  %v977_v15 = vrot.slane %v253_v3, %v425_v6  ;;  %v979_v17 = vrot.slane %v252_v2, %v406_v7  ;;  %v981_v18 = vrot.slane %v253_v3, %v406_v7  ;;  %778 = vst [vmem:[%s1135_s28 + $0x8] sm:$0xf] %v973_v13 }
  0x13   : > { %v364_v19 = vcombine.low %v959_v9, %v961_v10  ;;  %v985_v20 = vrot.slane %v252_v2, %v338_v16  ;;  %v987_v21 = vrot.slane %v253_v3, %v338_v16  ;;  %372 = vrot.lane.b32.xlu0 %v957_v8, %s893_s9  ;;  %443 = vrot.lane.b32.xlu1 %v973_v13, %s891_s7  ;;  %v275_v30 = vsub.s32 0, %v274_v1 }
  0x14   : > { %v994_v25 = vrot.slane %v252_v2, %v294_v23  ;;  %v996_v26 = vrot.slane %v253_v3, %v294_v23  ;;  %v1002_v28 = vrot.slane %v252_v2, %v319_v27  ;;  %v1004_v29 = vrot.slane %v253_v3, %v319_v27 }
  0x15   : > { %v366_v22 = vmul.f32 %v364_v19, %v957_v8  ;;  %v1010_v31 = vrot.slane %v252_v2, %v275_v30  ;;  %v1012_v32 = vrot.slane %v253_v3, %v275_v30  ;;  %vm445_vm0 = vcmp.lt.s32.totalorder %v1034_v36, 111 }
  0x16   : > { %vm376_vm1 = vcmp.lt.s32.totalorder %v1034_v36, 127  ;;  %vm420_vm2 = vcmp.lt.s32.totalorder %v1034_v36, 112  ;;  %vm401_vm3 = vcmp.lt.s32.totalorder %v1034_v36, 113  ;;  %vm333_vm5 = vcmp.lt.s32.totalorder %v1034_v36, 1 }
  0x17   : > { %v368_v24 = vcombine.high %v366_v22, %v366_v22  ;;  %370 = vst [vmem:[#allocation2 + $0x20] sm:$0xf] %v366_v22  ;;  %374 = vrot.lane.b32.xlu1 %v973_v13, %s893_s9  ;;  %418 = vrot.lane.b32.xlu0 %v973_v13, %s892_s8  ;;  %vm289_vm6 = vcmp.lt.s32.totalorder %v1034_v36, 16  ;;  %vm314_vm7 = vcmp.lt.s32.totalorder %v1034_v36, 15  ;;  %vm270_vm8 = vcmp.lt.s32.totalorder %v1034_v36, 17 }
  0x19   : > { %371 = vst [vmem:[#allocation2 + $0x8] sm:$0xf] %v368_v24 }
  0x1b   : > { %399 = vrot.lane.b32.xlu1 %v973_v13, %s894_s10  ;;  %397 = vrot.lane.b32.xlu0 %v957_v8, %s894_s10 }
  0x1f   : > { %331 = vrot.lane.b32.xlu1 %v973_v13, %s895_s11  ;;  %329 = vrot.lane.b32.xlu0 %v957_v8, %s895_s11 }
  0x23   : > { %287 = vrot.lane.b32.xlu1 %v973_v13, %s896_s12  ;;  %285 = vrot.lane.b32.xlu0 %v957_v8, %s896_s12 }
  0x27   : > { %312 = vrot.lane.b32.xlu1 %v973_v13, %s897_s13  ;;  %310 = vrot.lane.b32.xlu0 %v957_v8, %s897_s13 }
  0x2b   : > { %266 = vrot.lane.b32.xlu1 %v973_v13, %s899_s14  ;;  %264 = vrot.lane.b32.xlu0 %v957_v8, %s899_s14 }
  0x2f   : > { %472 = vperm.xlu0 %881, %v258_v35  }
  0x81   : > { %v442_v37 = vpop.permute.xlu1 %441  ;;  %v417_v38 = vpop.permute.xlu0 %416 }
  0x85   : > { %v373_v41 = vpop.permute.xlu0 %372  ;;  %v444_v42 = vpop.permute.xlu1 %443 }
  0x86   : > { %v446_v43 = vsel %vm445_vm0, %v442_v37, %v444_v42  ;;  %v447_v44 = vsel %vm445_vm0, %v444_v42, %v442_v37 }
  0x87   : > { %v456_v45 = vmul.f32 %v1040_v39, %v446_v43  ;;  %v457_v46 = vmul.f32 %v1045_v40, %v447_v44 }
  0x89   : > { %458 = vst [vmem:[#allocation2 + $0x88] sm:$0xf] %v456_v45  ;;  %459 = vst [vmem:[#allocation2 + $0x40] sm:$0xf] %v457_v46  ;;  %v375_v47 = vpop.permute.xlu1 %374  ;;  %v419_v48 = vpop.permute.xlu0 %418 }
  0x8a   : > { %v377_v49 = vsel %vm376_vm1, %v373_v41, %v375_v47  ;;  %v378_v50 = vsel %vm376_vm1, %v375_v47, %v373_v41  ;;  %v421_v51 = vsel %vm420_vm2, %v417_v38, %v419_v48  ;;  %v422_v52 = vsel %vm420_vm2, %v419_v48, %v417_v38 }
  0x8b   : > { %v387_v53 = vmul.f32 %v963_v11, %v377_v49  ;;  %v388_v54 = vmul.f32 %v965_v12, %v378_v50  ;;  %v431_v55 = vmul.f32 %v975_v14, %v421_v51  ;;  %v432_v56 = vmul.f32 %v977_v15, %v422_v52 }
  0x8d   : > { %v391_v57 = vrot.slane %v387_v53, 4  ;;  %v392_v58 = vrot.slane %v388_v54, 4  ;;  %v435_v59 = vrot.slane %v431_v55, 4  ;;  %v436_v60 = vrot.slane %v432_v56, 4  ;;  %v400_v61 = vpop.permute.xlu1 %399  ;;  %v398_v62 = vpop.permute.xlu0 %397 }
  0x8e   : > { %v402_v63 = vsel %vm401_vm3, %v398_v62, %v400_v61  ;;  %v403_v0 = vsel %vm401_vm3, %v400_v61, %v398_v62  ;;  %v256_v62 = vld [vmem:[%s1230_s2] sm:$0xf] }
  0x8f   : > { %395 = vst [vmem:[#allocation2 + $0x20] sm:$0xf0] %v391_v57  ;;  %396 = vst [vmem:[#allocation2 + $0x8] sm:$0xf0] %v392_v58  ;;  %v412_v1 = vmul.f32 %v979_v17, %v402_v63  ;;  %v413_v2 = vmul.f32 %v981_v18, %v403_v0 }
  0x90   : > { %439 = vst [vmem:[#allocation2 + $0x70] sm:$0xf0] %v435_v59  ;;  %440 = vst [vmem:[#allocation2 + $0x80] sm:$0xf0] %v436_v60  ;;  %v469_v3 = vld [vmem:[#allocation2 + $0x40] sm:$0xf] }
  0x91   : > { %v468_v4 = vld [vmem:[#allocation2 + $0x88] sm:$0xf]  ;;  %414 = vst [vmem:[#allocation2 + $0x70] sm:$0xf] %v412_v1  ;;  %415 = vst [vmem:[#allocation2 + $0x80] sm:$0xf] %v413_v2  ;;  %855 = vmatprep.subr.msk.mxu0 %vm479_vm4, %v469_v3  ;;  %v332_v5 = vpop.permute.xlu1 %331  ;;  %v330_v6 = vpop.permute.xlu0 %329 }
  0x92   : > { %v334_v7 = vsel %vm333_vm5, %v330_v6, %v332_v5  ;;  %v335_v16 = vsel %vm333_vm5, %v332_v5, %v330_v6  ;;  %856 = vmatpush1.msk.msra.mxu0 %vm479_vm4, %v468_v4 }
  0x93   : > { %v344_v19 = vmul.f32 %v985_v20, %v335_v16  ;;  %v345_v22 = vmul.f32 %v987_v21, %v334_v7 }
  0x95   : > { %v348_v23 = vrot.slane %v344_v19, 4  ;;  %v349_v24 = vrot.slane %v345_v22, 4  ;;  %v288_v27 = vpop.permute.xlu1 %287  ;;  %v286_v30 = vpop.permute.xlu0 %285 }
  0x96   : > { %v290_v33 = vsel %vm289_vm6, %v286_v30, %v288_v27  ;;  %v291_v34 = vsel %vm289_vm6, %v288_v27, %v286_v30  ;;  %v1101_v48 = vld [vmem:[#allocation2 + $0x8] sm:$0xff]  ;;  %v1106_v51 = vld [vmem:[#allocation2 + $0x20] sm:$0xff] }
  0x97   : > { %352 = vst [vmem:[#allocation2 + $0x78] sm:$0xf0] %v348_v23  ;;  %353 = vst [vmem:[#allocation2 + $0x58] sm:$0xf0] %v349_v24  ;;  %v300_v35 = vmul.f32 %v994_v25, %v291_v34  ;;  %v301_v37 = vmul.f32 %v996_v26, %v290_v33 }
  0x98   : > { %v1091_v38 = vld [vmem:[#allocation2 + $0x80] sm:$0xff]  ;;  %v1093_v41 = vld [vmem:[#allocation2 + $0x70] sm:$0xff] }
  0x99   : > { %v304_v42 = vrot.slane %v300_v35, 4  ;;  %v305_v43 = vrot.slane %v301_v37, 4  ;;  %v313_v44 = vpop.permute.xlu1 %312  ;;  %510 = vmatprep.subr.mxu0 %v1091_v38  ;;  %v311_v45 = vpop.permute.xlu0 %310 }
  0x9a   : > { %v315_v46 = vsel %vm314_vm7, %v311_v45, %v313_v44  ;;  %v316_v47 = vsel %vm314_vm7, %v313_v44, %v311_v45  ;;  %511 = vmatpush1.msra.mxu0 %v1093_v41 }
  0x9b   : > { %308 = vst [vmem:[#allocation2] sm:$0xf0] %v304_v42  ;;  %309 = vst [vmem:[#allocation2 + $0x38] sm:$0xf0] %v305_v43  ;;  %v325_v49 = vmul.f32 %v1002_v28, %v316_v47  ;;  %v326_v50 = vmul.f32 %v1004_v29, %v315_v46  ;;  %512 = vmatprep.subr.mxu0 %v1101_v48 }
  0x9c   : > { %513 = vmatpush1.msra.mxu0 %v1106_v51 }
  0x9d   : > { %327 = vst [vmem:[#allocation2 + $0x78] sm:$0xf] %v325_v49  ;;  %328 = vst [vmem:[#allocation2 + $0x58] sm:$0xf] %v326_v50  ;;  %v267_v52 = vpop.permute.xlu1 %266  ;;  %v265_v53 = vpop.permute.xlu0 %264 }
  0x9e   : > { %v271_v54 = vsel %vm270_vm8, %v265_v53, %v267_v52  ;;  %v272_v55 = vsel %vm270_vm8, %v267_v52, %v265_v53 }
  0x9f   : > { %v281_v56 = vmul.f32 %v1010_v31, %v272_v55  ;;  %v282_v57 = vmul.f32 %v1012_v32, %v271_v54 }
  0xa1   : > { %283 = vst [vmem:[#allocation2] sm:$0xf] %v281_v56  ;;  %284 = vst [vmem:[#allocation2 + $0x38] sm:$0xf] %v282_v57 }
  0xa4   : > { %v1116_v58 = vld [vmem:[#allocation2 + $0x58] sm:$0xff] }
  0xa5   : > { %v1118_v59 = vld [vmem:[#allocation2 + $0x78] sm:$0xff]  ;;  %514 = vmatprep.subr.mxu0 %v1116_v58 }
  0xa6   : > { %515 = vmatpush1.msra.mxu0 %v1118_v59 }
  0xa8   : > { %v1122_v60 = vld [vmem:[#allocation2 + $0x38] sm:$0xff]  ;;  %v1124_v61 = vld [vmem:[#allocation2] sm:$0xff] }
  0xa9   : > { %516 = vmatprep.subr.mxu0 %v1122_v60 }
  0xaa   : > { %517 = vmatpush1.msra.mxu0 %v1124_v61  ;;  %v473_v63 = vpop.permute.xlu0 %472 }
  0xab   : > { %857 = vmatmul.mubr.msk.f32.vlgmr.msra.gmra.mxu0 %vm475_vm9, %v256_v62 }
 0x16b   : > { %v552_v0 = vpop.f32.mrf.mxu0 }
 0x16c   : > { %v553_v1 = vadd.f32 %v552_v0, %v473_v63 }
 0x16d   : > { %v554_v2 = vpop.f32.mrf.mxu0 }
 0x16e   : > { %v557_v3 = vmul.f32 0.2, %v553_v1  ;;  %v555_v4 = vadd.f32 %v554_v2, %v473_v63 }
 0x170   : > { %v559_v5 = vmax.f32 %v553_v1, %v557_v3  ;;  %v558_v6 = vmul.f32 0.2, %v555_v4 }
 0x172   : > { %v560_v7 = vmax.f32 %v555_v4, %v558_v6  ;;  %633 = vrot.lane.b32.xlu0 %v559_v5, %s894_s10  ;;  %659 = vrot.lane.b32.xlu1 %v559_v5, %s891_s7  ;;  %v613_v16 = vmul.f32 %v559_v5, %v959_v9  ;;  %v781_v8 = vrot.slane %v559_v5, 4  ;;  %v259_v9 = vld [vmem:[%s1233_s5] sm:$0xf] }
 0x174   : > { %v614_v13 = vmul.f32 %v560_v7, %v961_v10  ;;  %v617_v19 = vrot.slane %v613_v16, 4  ;;  %v782_v22 = vrot.slane %v560_v7, 4  ;;  %785 = vst [vmem:[%s1135_s28] sm:$0xf0] %v781_v8 }
 0x176   : > { %649 = vrot.lane.b32.xlu0 %v559_v5, %s892_s8  ;;  %661 = vrot.lane.b32.xlu1 %v560_v7, %s891_s7  ;;  %v618_v23 = vrot.slane %v614_v13, 4  ;;  %621 = vst [vmem:[#allocation2 + $0x10] sm:$0xf0] %v617_v19  ;;  %786 = vst [vmem:[%s1135_s28 + $0x8] sm:$0xf0] %v782_v22 }
 0x178   : > { %622 = vst [vmem:[#allocation2 + $0x48] sm:$0xf0] %v618_v23 }
 0x17a   : > { %623 = vrot.lane.b32.xlu0 %v559_v5, %s893_s9  ;;  %635 = vrot.lane.b32.xlu1 %v560_v7, %s894_s10 }
 0x17e   : > { %587 = vrot.lane.b32.xlu0 %v559_v5, %s897_s13  ;;  %651 = vrot.lane.b32.xlu1 %v560_v7, %s892_s8 }
 0x182   : > { %603 = vrot.lane.b32.xlu0 %v559_v5, %s895_s11  ;;  %625 = vrot.lane.b32.xlu1 %v560_v7, %s893_s9 }
 0x186   : > { %561 = vrot.lane.b32.xlu0 %v559_v5, %s899_s14  ;;  %589 = vrot.lane.b32.xlu1 %v560_v7, %s897_s13 }
 0x18a   : > { %577 = vrot.lane.b32.xlu0 %v559_v5, %s896_s12  ;;  %605 = vrot.lane.b32.xlu1 %v560_v7, %s895_s11 }
 0x18e   : > { %695 = vperm.xlu0 %881, %v259_v9   ;;  %563 = vrot.lane.b32.xlu1 %v560_v7, %s899_s14 }
 0x192   : > { %579 = vrot.lane.b32.xlu1 %v560_v7, %s896_s12 }
 0x1e4   : > { %v634_v10 = vpop.permute.xlu0 %633  ;;  %v660_v24 = vpop.permute.xlu1 %659 }
 0x1e8   : > { %v650_v27 = vpop.permute.xlu0 %649  ;;  %v662_v30 = vpop.permute.xlu1 %661 }
 0x1e9   : > { %v663_v33 = vsel %vm445_vm0, %v660_v24, %v662_v30  ;;  %v664_v34 = vsel %vm445_vm0, %v662_v30, %v660_v24 }
 0x1ea   : > { %v665_v35 = vmul.f32 %v1040_v39, %v663_v33  ;;  %v666_v37 = vmul.f32 %v1045_v40, %v664_v34 }
 0x1ec   : > { %v669_v42 = vrot.slane %v665_v35, 4  ;;  %v670_v43 = vrot.slane %v666_v37, 4  ;;  %v624_v44 = vpop.permute.xlu0 %623  ;;  %v636_v45 = vpop.permute.xlu1 %635 }
 0x1ed   : > { %v637_v46 = vsel %vm401_vm3, %v634_v10, %v636_v45  ;;  %v638_v47 = vsel %vm401_vm3, %v636_v45, %v634_v10 }
 0x1ee   : > { %673 = vst [vmem:[#allocation2 + $0x68] sm:$0xf0] %v669_v42  ;;  %674 = vst [vmem:[#allocation2 + $0x60] sm:$0xf0] %v670_v43  ;;  %v639_v49 = vmul.f32 %v637_v46, %v979_v17  ;;  %v640_v50 = vmul.f32 %v638_v47, %v981_v18 }
 0x1f0   : > { %v643_v52 = vrot.slane %v639_v49, 4  ;;  %v644_v39 = vrot.slane %v640_v50, 4  ;;  %v652_v53 = vpop.permute.xlu1 %651  ;;  %v588_v55 = vpop.permute.xlu0 %587 }
 0x1f1   : > { %v653_v40 = vsel %vm420_vm2, %v650_v27, %v652_v53  ;;  %v654_v54 = vsel %vm420_vm2, %v652_v53, %v650_v27 }
 0x1f2   : > { %647 = vst [vmem:[#allocation2 + $0x30] sm:$0xf0] %v643_v52  ;;  %648 = vst [vmem:[#allocation2 + $0x18] sm:$0xf0] %v644_v39  ;;  %v655_v56 = vmul.f32 %v653_v40, %v975_v14  ;;  %v656_v57 = vmul.f32 %v654_v54, %v977_v15 }
 0x1f4   : > { %657 = vst [vmem:[#allocation2 + $0x68] sm:$0xf] %v655_v56  ;;  %658 = vst [vmem:[#allocation2 + $0x60] sm:$0xf] %v656_v57  ;;  %v626_v17 = vpop.permute.xlu1 %625  ;;  %v604_v1 = vpop.permute.xlu0 %603 }
 0x1f5   : > { %v627_v18 = vsel %vm376_vm1, %v624_v44, %v626_v17  ;;  %v628_v62 = vsel %vm376_vm1, %v626_v17, %v624_v44 }
 0x1f6   : > { %v629_v63 = vmul.f32 %v627_v18, %v963_v11  ;;  %v630_v0 = vmul.f32 %v628_v62, %v965_v12 }
 0x1f8   : > { %631 = vst [vmem:[#allocation2 + $0x30] sm:$0xf] %v629_v63  ;;  %632 = vst [vmem:[#allocation2 + $0x18] sm:$0xf] %v630_v0  ;;  %v590_v2 = vpop.permute.xlu1 %589  ;;  %v562_v13 = vpop.permute.xlu0 %561 }
 0x1f9   : > { %v591_v14 = vsel %vm314_vm7, %v588_v55, %v590_v2  ;;  %v592_v15 = vsel %vm314_vm7, %v590_v2, %v588_v55 }
 0x1fa   : > { %v593_v3 = vmul.f32 %v592_v15, %v1002_v28  ;;  %v594_v4 = vmul.f32 %v591_v14, %v1004_v29 }
 0x1fb   : > { %v692_v5 = vld [vmem:[#allocation2 + $0x60] sm:$0xff]  ;;  %v691_v6 = vld [vmem:[#allocation2 + $0x68] sm:$0xff] }
 0x1fc   : > { %v597_v7 = vrot.slane %v593_v3, 4  ;;  %v598_v11 = vrot.slane %v594_v4, 4  ;;  %716 = vmatprep.subr.mxu1 %v692_v5  ;;  %v606_v12 = vpop.permute.xlu1 %605 }
 0x1fd   : > { %v607_v16 = vsel %vm333_vm5, %v604_v1, %v606_v12  ;;  %v608_v8 = vsel %vm333_vm5, %v606_v12, %v604_v1  ;;  %717 = vmatpush1.msra.mxu1 %v691_v6 }
 0x1fe   : > { %601 = vst [vmem:[#allocation2 + $0x50] sm:$0xf0] %v597_v7  ;;  %602 = vst [vmem:[#allocation2 + $0x28] sm:$0xf0] %v598_v11  ;;  %v609_v28 = vmul.f32 %v608_v8, %v985_v20  ;;  %v610_v29 = vmul.f32 %v607_v16, %v987_v21  ;;  %v578_v20 = vpop.permute.xlu0 %577 }
 0x1ff   : > { %v690_v19 = vld [vmem:[#allocation2 + $0x18] sm:$0xff]  ;;  %v689_v22 = vld [vmem:[#allocation2 + $0x30] sm:$0xff] }
 0x200   : > { %611 = vst [vmem:[#allocation2 + $0x10] sm:$0xf] %v609_v28  ;;  %612 = vst [vmem:[#allocation2 + $0x48] sm:$0xf] %v610_v29  ;;  %718 = vmatprep.subr.mxu1 %v690_v19  ;;  %v564_v23 = vpop.permute.xlu1 %563 }
 0x201   : > { %v565_v9 = vsel %vm270_vm8, %v562_v13, %v564_v23  ;;  %v566_v10 = vsel %vm270_vm8, %v564_v23, %v562_v13  ;;  %719 = vmatpush1.msra.mxu1 %v689_v22 }
 0x202   : > { %v567_v24 = vmul.f32 %v566_v10, %v1010_v31  ;;  %v568_v27 = vmul.f32 %v565_v9, %v1012_v32 }
 0x204   : > { %v571_v30 = vrot.slane %v567_v24, 4  ;;  %v572_v21 = vrot.slane %v568_v27, 4  ;;  %v580_v33 = vpop.permute.xlu1 %579 }
 0x205   : > { %v581_v34 = vsel %vm289_vm6, %v578_v20, %v580_v33  ;;  %v582_v35 = vsel %vm289_vm6, %v580_v33, %v578_v20 }
 0x206   : > { %575 = vst [vmem:[#allocation2 + $0x88] sm:$0xf0] %v571_v30  ;;  %576 = vst [vmem:[#allocation2 + $0x40] sm:$0xf0] %v572_v21  ;;  %v583_v37 = vmul.f32 %v582_v35, %v994_v25  ;;  %v584_v42 = vmul.f32 %v581_v34, %v996_v26  ;;  %v257_v25 = vld [vmem:[%s1232_s4] sm:$0xf] }
 0x207   : > { %v688_v43 = vld [vmem:[#allocation2 + $0x48] sm:$0xff]  ;;  %v687_v31 = vld [vmem:[#allocation2 + $0x10] sm:$0xff] }
 0x208   : > { %585 = vst [vmem:[#allocation2 + $0x50] sm:$0xf] %v583_v37  ;;  %586 = vst [vmem:[#allocation2 + $0x28] sm:$0xf] %v584_v42  ;;  %720 = vmatprep.subr.mxu1 %v688_v43 }
 0x209   : > { %721 = vmatpush1.msra.mxu1 %v687_v31  ;;  %v696_v26 = vpop.permute.xlu0 %695 }
 0x20d   : > { %v684_v45 = vld [vmem:[#allocation2 + $0x40] sm:$0xff]  ;;  %v683_v36 = vld [vmem:[#allocation2 + $0x88] sm:$0xff] }
 0x20f   : > { %v686_v32 = vld [vmem:[#allocation2 + $0x28] sm:$0xff]  ;;  %v685_v44 = vld [vmem:[#allocation2 + $0x50] sm:$0xff] }
 0x210   : > { %722 = vmatprep.subr.mxu1 %v686_v32 }
 0x211   : > { %723 = vmatpush1.msra.mxu1 %v685_v44 }
 0x212   : > { %724 = vmatprep.subr.mxu1 %v684_v45 }
 0x213   : > { %725 = vmatpush1.msra.mxu1 %v683_v36 }
 0x214   : > { %726 = vmatprep.subr.mxu1 %v1091_v38 }
 0x215   : > { %727 = vmatpush1.msra.mxu1 %v1093_v41 }
 0x216   : > { %728 = vmatprep.subr.mxu1 %v1101_v48 }
 0x217   : > { %729 = vmatpush1.msra.mxu1 %v1106_v51 }
 0x218   : > { %730 = vmatprep.subr.mxu1 %v1116_v58 }
 0x219   : > { %731 = vmatpush1.msra.mxu1 %v1118_v59 }
 0x21a   : > { %732 = vmatprep.subr.mxu1 %v1122_v60 }
 0x21b   : > { %733 = vmatpush1.msra.mxu1 %v1124_v61 }
 0x21c   : > { %858 = vmatmul.mubr.msk.f32.vlgmr.msra.gmra.mxu1 %vm698_vm10, %v257_v25 }
 0x2dc   : > { %v768_v38 = vpop.f32.mrf.mxu1 }
 0x2dd   : > { %v769_v41 = vadd.f32 %v768_v38, %v696_v26 }
 0x2de   : > { %v770_v48 = vpop.f32.mrf.mxu1 }
 0x2df   : > { %v773_v51 = vmul.f32 0.2, %v769_v41  ;;  %v771_v46 = vadd.f32 %v770_v48, %v696_v26 }
 0x2e1   : > { %v775_v58 = vmax.f32 %v769_v41, %v773_v51  ;;  %v774_v47 = vmul.f32 0.2, %v771_v46 }
 0x2e3   : > { %787 = vst [vmem:[%s1135_s28 + $0x10] sm:$0xf] %v775_v58  ;;  %v776_v59 = vmax.f32 %v771_v46, %v774_v47 }
 0x2e5   : > { %788 = vst [vmem:[%s1135_s28 + $0x18] sm:$0xf] %v776_v59 }
 0x2e6 PF: > { %s16_s21 = sadd.s32 1, %s889_s21  }
 0x2e7   : > { %p13_p4 = scmp.ge.s32.totalorder %s16_s21, 4  }
 0x2e9   :  { %15 = sbr.rel (!%p13_p4) target bundleno = 1 (0x1), region = 74 }

</bundles_post_ra>
